<compile_context>
chip_gen: v7x
topology: tpu7x:2x2x1
jax: 0.10.0
libtpu: 0.0.40
codegen_flags: <defaults>
</compile_context>

<pallas_src>
import functools

import jax
import jax.numpy as jnp
from jax import lax
from jax.experimental import pallas as pl
from jax.experimental.pallas import tpu as pltpu

DIM = 2        # input node / edge feature dim
HID = 32       # NNConv output channels
MLP_H = 16     # hidden width of the edge MLPs

# bf16 is exact for the 0/1 scatter one-hot; storing/aggregating messages in
# bf16 adds ~2^-8 relative rounding vs the f32 reference.  Set to jnp.float32
# for a bit-exact validation path.
AGG_DTYPE = jnp.bfloat16


def _round_up(v, m):
    return ((v + m - 1) // m) * m


def _vmem_capacity_bytes():
    """Physical per-core VMEM; conservative 64 MiB (v7x) if query fails."""
    try:
        info = pltpu.get_tpu_info()
        for attr in ("vmem_capacity_bytes", "vmem_bytes", "vmem_size_bytes"):
            v = getattr(info, attr, None)
            if v:
                return int(v)
    except Exception:
        pass
    return 64 * 2**20


# --------------------------------------------------------------------------
# Kernel 1: per-edge messages.  grid = (edge_blocks,)  ("parallel")
# Each edge is touched exactly once, all MXU work.
# --------------------------------------------------------------------------
def msg_kernel(ea_ref, hsrc_ref, w1_ref, b1_ref, w2cat_ref, rmat_ref, tmat_ref,
               cvec_ref, msg_ref):
    ea = ea_ref[...]                                   # [TE, DIM]
    h_src = hsrc_ref[...]                              # [TE, in_c]  (pre-gathered)

    # Edge MLP hidden layer.
    hmid = jnp.maximum(
        jnp.dot(ea, w1_ref[...], preferred_element_type=jnp.float32)
        + b1_ref[...], 0.0)                            # [TE, MLP_H]

    # zcat[e, d*MLP_H+m] = h_src[e,d]*hmid[e,m]   (the rank-expanded product)
    # zcat[e, zc + d]    = h_src[e,d]             (bias path of the edge MLP)
    # built purely from two constant-matrix matmuls + a broadcast add, so the
    # whole message is ONE matmul against the stacked [w2r; b2r] weight.
    zcat = (jnp.dot(h_src, rmat_ref[...], preferred_element_type=jnp.float32)
            * (jnp.dot(hmid, tmat_ref[...], preferred_element_type=jnp.float32)
               + cvec_ref[...]))                       # [TE, zc + in_c]
    msg = jnp.dot(zcat, w2cat_ref[...],
                  preferred_element_type=jnp.float32)  # [TE, HID]
    msg_ref[...] = msg.astype(msg_ref.dtype)


# --------------------------------------------------------------------------
# Kernel 2: scatter-add aggregation + finalize.
# grid = (node_blocks "parallel", edge_blocks "arbitrary")
# --------------------------------------------------------------------------
def agg_kernel(apply_out_proj, hnode_ref, msg_ref, dst_ref, root_ref, bias_ref,
               *rest):
    if apply_out_proj:
        wout_ref, bout_ref, out_ref, agg_ref = rest
    else:
        out_ref, agg_ref = rest
        wout_ref = bout_ref = None

    nb = pl.program_id(0)
    eb = pl.program_id(1)
    n_eb = pl.num_programs(1)
    tn = agg_ref.shape[0]
    te = dst_ref.shape[1]

    @pl.when(eb == 0)
    def _init():
        agg_ref[...] = jnp.zeros_like(agg_ref)

    # Scatter one-hot built directly in [node, edge] layout (dst is [1, TE])
    # so the scatter-add is a plain MXU matmul — no XLU transpose.
    dst = dst_ref[...]                                              # [1, TE]
    row_ids = lax.broadcasted_iota(jnp.int32, (tn, te), 0) + nb * tn
    scatter = (row_ids == dst).astype(AGG_DTYPE)                    # [TN, TE]
    agg_ref[...] += jnp.dot(scatter, msg_ref[...],
                            preferred_element_type=jnp.float32)     # [TN, HID]

    # Finalize on the last edge block: root transform + bias + ReLU (+ fc2).
    @pl.when(eb == n_eb - 1)
    def _finalize():
        h_out = jnp.maximum(
            jnp.dot(hnode_ref[...], root_ref[...],
                    preferred_element_type=jnp.float32)
            + bias_ref[...] + agg_ref[...], 0.0)                    # [TN, HID]
        if apply_out_proj:
            out_ref[...] = (jnp.dot(h_out, wout_ref[...],
                                    preferred_element_type=jnp.float32)
                            + bout_ref[...])                        # [TN, 128]
        else:
            out_ref[...] = h_out                                    # [TN, HID]


# --------------------------------------------------------------------------
# Host-side weight prep: tiny reshapes / constant expansion matrices so the
# kernels only do MXU matmuls.
# --------------------------------------------------------------------------
def _prep_layer(w1, b1, w2, b2, root, bias, in_c):
    zc = in_c * MLP_H
    # w2r[d*MLP_H + m, h] = w2[m, d*HID + h] ; b2r[d, h] = b2[0, d*HID + h]
    w2r = w2.reshape(MLP_H, in_c, HID).transpose(1, 0, 2).reshape(zc, HID)
    b2r = b2.reshape(in_c, HID)
    w2cat = jnp.concatenate([w2r, b2r], axis=0)                  # [zc+in_c, HID]
    # rmat: [R | I]   (expands h_src along zcat columns; identity for bias path)
    rmat = jnp.concatenate(
        [jnp.kron(jnp.eye(in_c, dtype=jnp.float32),
                  jnp.ones((1, MLP_H), jnp.float32)),
         jnp.eye(in_c, dtype=jnp.float32)], axis=1)              # [in_c, zc+in_c]
    # tmat: [T | 0]   (tiles hmid along zcat columns; zero for bias path)
    tmat = jnp.concatenate(
        [jnp.tile(jnp.eye(MLP_H, dtype=jnp.float32), (1, in_c)),
         jnp.zeros((MLP_H, in_c), jnp.float32)], axis=1)         # [MLP_H, zc+in_c]
    # cvec: [0 | 1]   (makes the second factor exactly 1 on the bias columns)
    cvec = jnp.concatenate(
        [jnp.zeros((1, zc), jnp.float32),
         jnp.ones((1, in_c), jnp.float32)], axis=1)              # [1, zc+in_c]
    return (w1, b1, w2cat, rmat, tmat, cvec, root, bias)


# --------------------------------------------------------------------------
# Forward wrapper.
# --------------------------------------------------------------------------
def net_mp_forward(x, edge_index, edge_attr, params, *, te_max=None, tn_max=1024):
    """x: [N, DIM] f32, edge_index: [2, E] int, edge_attr: [E, DIM] f32 -> [N, 1]."""
    N = x.shape[0]
    E = edge_attr.shape[0]

    vmem_cap = _vmem_capacity_bytes()
    vmem_budget = int(max(min(vmem_cap - 16 * 2**20, 100 * 2**20), 32 * 2**20))
    if te_max is None:
        te_max = 2048 if vmem_cap >= 96 * 2**20 else 1024

    # Node tiling: aim for >= 2 node blocks so v7x's second TC gets work on
    # the aggregation kernel (message kernel parallelizes over edge blocks).
    n8 = _round_up(N, 8)
    TN = min(tn_max, max(8, _round_up((n8 + 1) // 2, 8)))
    N_pad = _round_up(n8, TN)
    n_nb = N_pad // TN

    # Edge tiling: always a multiple of 128 (lane-dense dst / scatter operand).
    E128 = _round_up(max(E, 1), 128)
    TE = min(te_max, E128)
    E_pad = _round_up(E128, TE)
    n_eb = E_pad // TE

    # Padding: padded edges use src=0 (harmless; dropped at scatter) and
    # dst=-1 (matches no node row).
    x_pad = jnp.zeros((N_pad, DIM), jnp.float32).at[:N].set(x.astype(jnp.float32))
    ea_pad = jnp.zeros((E_pad, DIM), jnp.float32).at[:E].set(edge_attr.astype(jnp.float32))
    src_idx = jnp.zeros((E_pad,), jnp.int32).at[:E].set(edge_index[0].astype(jnp.int32))
    dst = jnp.full((1, E_pad), -1, jnp.int32).at[0, :E].set(edge_index[1].astype(jnp.int32))

    lp1 = _prep_layer(params["w11"], params["b11"], params["w12"], params["b12"],
                      params["root1"], params["bias1"], DIM)
    lp2 = _prep_layer(params["w21"], params["b21"], params["w22"], params["b22"],
                      params["root2"], params["bias2"], HID)

    # fc2 fused into conv2's finalize (lane-dense 128-wide store) only while
    # the zero-padded writeback stays cheap; large graphs (v5e HBM) fall back
    # to an XLA matvec on the [N, 32] conv2 output.
    fuse_fc2 = N_pad <= 8192
    if fuse_fc2:
        wout = jnp.zeros((HID, 128), jnp.float32).at[:, :1].set(params["wfc2"])
        bout = jnp.zeros((1, 128), jnp.float32).at[:, :1].set(params["bfc2"])

    def vmem_limit(est):
        return int(min(max(2 * est, 32 * 2**20), vmem_budget))

    itm_sz = 2 if AGG_DTYPE == jnp.bfloat16 else 4
    f32 = 4

    def nnconv_layer(h_in, in_c, lp, wout_p=None, bout_p=None):
        w1, b1, w2cat, rmat, tmat, cvec, root, bias = lp
        zc = in_c * MLP_H

        # Source-node features gathered ONCE on the XLA side (no in-kernel
        # O(TE*N_pad) one-hot gather), streamed per edge block.
        h_src = jnp.take(h_in, src_idx, axis=0)                     # [E_pad, in_c]

        # ---------------- message kernel ----------------
        msg_est = (2 * TE * (DIM + in_c) * f32 + 2 * TE * HID * itm_sz
                   + 2 * f32 * (DIM * MLP_H + MLP_H + (zc + in_c) * (HID + in_c + MLP_H + 1))
                   + f32 * TE * (MLP_H + 4 * (zc + in_c) + HID))
        msg = pl.pallas_call(
            msg_kernel,
            grid=(n_eb,),
            in_specs=[
                pl.BlockSpec((TE, DIM), lambda eb: (eb, 0)),
                pl.BlockSpec((TE, in_c), lambda eb: (eb, 0)),
                pl.BlockSpec(w1.shape, lambda eb: (0, 0)),
                pl.BlockSpec(b1.shape, lambda eb: (0, 0)),
                pl.BlockSpec(w2cat.shape, lambda eb: (0, 0)),
                pl.BlockSpec(rmat.shape, lambda eb: (0, 0)),
                pl.BlockSpec(tmat.shape, lambda eb: (0, 0)),
                pl.BlockSpec(cvec.shape, lambda eb: (0, 0)),
            ],
            out_specs=pl.BlockSpec((TE, HID), lambda eb: (eb, 0)),
            out_shape=jax.ShapeDtypeStruct((E_pad, HID), AGG_DTYPE),
            compiler_params=pltpu.CompilerParams(
                dimension_semantics=("parallel",),
                vmem_limit_bytes=vmem_limit(msg_est)),
        )(ea_pad, h_src, w1, b1, w2cat, rmat, tmat, cvec)

        # ---------------- aggregation + finalize kernel ----------------
        apply_out = wout_p is not None
        out_w = wout_p.shape[1] if apply_out else HID

        in_arrays = [h_in, msg, dst, root, bias]
        in_specs = [
            pl.BlockSpec((TN, in_c), lambda nb, eb: (nb, 0)),   # node block (root path)
            pl.BlockSpec((TE, HID),  lambda nb, eb: (eb, 0)),   # message block
            pl.BlockSpec((1, TE),    lambda nb, eb: (0, eb)),   # dst ([1, E] layout)
            pl.BlockSpec(root.shape, lambda nb, eb: (0, 0)),
            pl.BlockSpec(bias.shape, lambda nb, eb: (0, 0)),
        ]
        if apply_out:
            in_arrays += [wout_p, bout_p]
            in_specs += [pl.BlockSpec(wout_p.shape, lambda nb, eb: (0, 0)),
                         pl.BlockSpec(bout_p.shape, lambda nb, eb: (0, 0))]

        agg_est = (2 * (TE * HID * itm_sz + TE * f32 + TN * in_c * f32
                        + TN * out_w * f32)
                   + 2 * f32 * (in_c * HID + HID + HID * 128 + 128)
                   + TN * HID * f32
                   + TN * TE * (4 + itm_sz) + TN * (HID + out_w) * f32)
        return pl.pallas_call(
            functools.partial(agg_kernel, apply_out),
            grid=(n_nb, n_eb),
            in_specs=in_specs,
            out_specs=pl.BlockSpec((TN, out_w), lambda nb, eb: (nb, 0)),
            out_shape=jax.ShapeDtypeStruct((N_pad, out_w), jnp.float32),
            scratch_shapes=[pltpu.VMEM((TN, HID), jnp.float32)],
            compiler_params=pltpu.CompilerParams(
                dimension_semantics=("parallel", "arbitrary"),
                vmem_limit_bytes=vmem_limit(agg_est)),
        )(*in_arrays)

    x1 = nnconv_layer(x_pad, DIM, lp1)                       # relu(conv1): [N_pad, 32]
    if fuse_fc2:
        out128 = nnconv_layer(x1, HID, lp2, wout, bout)      # fc2(relu(conv2)): [N_pad, 128]
        return out128[:N, :1]
    x2 = nnconv_layer(x1, HID, lp2)                          # relu(conv2): [N_pad, 32]
    return x2[:N] @ params["wfc2"] + params["bfc2"]


# --------------------------------------------------------------------------
# Pure-JAX reference (for correctness check) and parameter init.
# --------------------------------------------------------------------------
def net_mp_reference(x, edge_index, edge_attr, params):
    src, dst = edge_index[0], edge_index[1]
    N = x.shape[0]

    def nnconv(h, in_c, w1, b1, w2, b2, root, bias):
        hmid = jnp.maximum(edge_attr @ w1 + b1, 0.0)
        we = (hmid @ w2 + b2).reshape(-1, in_c, HID)
        msg = jnp.einsum("ed,edh->eh", h[src], we)
        agg = jax.ops.segment_sum(msg, dst, num_segments=N)
        return h @ root + bias + agg

    x1 = jnp.maximum(nnconv(x, DIM, params["w11"], params["b11"], params["w12"],
                            params["b12"], params["root1"], params["bias1"]), 0.0)
    x2 = jnp.maximum(nnconv(x1, HID, params["w21"], params["b21"], params["w22"],
                            params["b22"], params["root2"], params["bias2"]), 0.0)
    return x2 @ params["wfc2"] + params["bfc2"]


def init_params(key):
    ks = jax.random.split(key, 16)

    def w(k, shape, scale=0.1):
        return (scale * jax.random.normal(k, shape)).astype(jnp.float32)

    return {
        # conv1 edge MLP: Linear(2,16) -> ReLU -> Linear(16, 2*32)
        "w11": w(ks[0], (DIM, MLP_H)),       "b11": w(ks[1], (1, MLP_H)),
        "w12": w(ks[2], (MLP_H, DIM * HID)), "b12": w(ks[3], (1, DIM * HID)),
        "root1": w(ks[4], (DIM, HID)),       "bias1": w(ks[5], (1, HID)),
        # conv2 edge MLP: Linear(2,16) -> ReLU -> Linear(16, 32*32)
        "w21": w(ks[6], (DIM, MLP_H)),       "b21": w(ks[7], (1, MLP_H)),
        "w22": w(ks[8], (MLP_H, HID * HID)), "b22": w(ks[9], (1, HID * HID)),
        "root2": w(ks[10], (HID, HID)),      "bias2": w(ks[11], (1, HID)),
        # fc2: Linear(32, 1)   (fc1 is defined in the PyTorch module but never used)
        "wfc2": w(ks[12], (HID, 1)),         "bfc2": w(ks[13], (1, 1)),
    }


if __name__ == "__main__":
    key = jax.random.PRNGKey(0)
    k_x, k_ea, k_ei, k_p = jax.random.split(key, 4)

    N, E = 8, 16
    x = jax.random.normal(k_x, (N, DIM), dtype=jnp.float32)
    edge_attr = jax.random.normal(k_ea, (E, DIM), dtype=jnp.float32)
    edge_index = jax.random.randint(k_ei, (2, E), 0, N, dtype=jnp.int32)
    params = init_params(k_p)

    out = net_mp_forward(x, edge_index, edge_attr, params)
    jax.block_until_ready(out)
    assert out.shape == (N, 1) and out.dtype == jnp.float32

    ref = net_mp_reference(x, edge_index, edge_attr, params)
    err = float(jnp.max(jnp.abs(out - ref)))
    assert err < 2e-2, f"mismatch vs reference: {err}"
    print("KERNEL_OK")
</pallas_src>

<mosaic_0001>
module attributes {stable_mosaic.version = 11 : i64} {
  func.func @msg_kernel(%arg0: i32, %arg1: memref<128x2xf32, #tpu.memory_space<vmem>>, %arg2: memref<128x2xf32, #tpu.memory_space<vmem>>, %arg3: memref<2x16xf32, #tpu.memory_space<vmem>>, %arg4: memref<1x16xf32, #tpu.memory_space<vmem>>, %arg5: memref<34x32xf32, #tpu.memory_space<vmem>>, %arg6: memref<2x34xf32, #tpu.memory_space<vmem>>, %arg7: memref<16x34xf32, #tpu.memory_space<vmem>>, %arg8: memref<1x34xf32, #tpu.memory_space<vmem>>, %arg9: memref<128x32xbf16, #tpu.memory_space<vmem>>) attributes {dimension_semantics = [#tpu.dimension_semantics<parallel>], iteration_bounds = array<i64: 1>, scalar_prefetch = 0 : i64, scratch_operands = 0 : i64, tpu.core_type = #tpu.core_type<tc>, window_params = [{transform_indices = @transform_0, window_bounds = array<i64: 128, 2>}, {transform_indices = @transform_1, window_bounds = array<i64: 128, 2>}, {pipeline_mode = #tpu.pipeline_mode<synchronous>, transform_indices = @transform_2, window_bounds = array<i64: 2, 16>}, {pipeline_mode = #tpu.pipeline_mode<synchronous>, transform_indices = @transform_3, window_bounds = array<i64: 1, 16>}, {pipeline_mode = #tpu.pipeline_mode<synchronous>, transform_indices = @transform_4, window_bounds = array<i64: 34, 32>}, {pipeline_mode = #tpu.pipeline_mode<synchronous>, transform_indices = @transform_5, window_bounds = array<i64: 2, 34>}, {pipeline_mode = #tpu.pipeline_mode<synchronous>, transform_indices = @transform_6, window_bounds = array<i64: 16, 34>}, {pipeline_mode = #tpu.pipeline_mode<synchronous>, transform_indices = @transform_7, window_bounds = array<i64: 1, 34>}, {transform_indices = @transform_8, window_bounds = array<i64: 128, 32>}]} {
    %c0 = arith.constant 0 : index
    %c0_0 = arith.constant 0 : index
    %0 = vector.load %arg1[%c0, %c0_0] : memref<128x2xf32, #tpu.memory_space<vmem>>, vector<128x2xf32>
    %c0_1 = arith.constant 0 : index
    %c0_2 = arith.constant 0 : index
    %1 = vector.load %arg2[%c0_1, %c0_2] : memref<128x2xf32, #tpu.memory_space<vmem>>, vector<128x2xf32>
    %c0_3 = arith.constant 0 : index
    %c0_4 = arith.constant 0 : index
    %2 = vector.load %arg3[%c0_3, %c0_4] : memref<2x16xf32, #tpu.memory_space<vmem>>, vector<2x16xf32>
    %cst = arith.constant dense<0.000000e+00> : vector<128x16xf32>
    %3 = tpu.matmul %0, %2, %cst {dimension_numbers = #tpu.dot_dimension_numbers<[1], [0], [0], [1], [0, 0, 1, 1], [], []>} : vector<128x2xf32>, vector<2x16xf32>, vector<128x16xf32> -> vector<128x16xf32>
    %c0_5 = arith.constant 0 : index
    %c0_6 = arith.constant 0 : index
    %4 = vector.load %arg4[%c0_5, %c0_6] : memref<1x16xf32, #tpu.memory_space<vmem>>, vector<1x16xf32>
    %5 = vector.broadcast %4 : vector<1x16xf32> to vector<128x16xf32>
    %6 = arith.addf %3, %5 : vector<128x16xf32>
    %cst_7 = arith.constant 0.000000e+00 : f32
    %7 = vector.broadcast %cst_7 : f32 to vector<128x16xf32>
    %8 = arith.maximumf %6, %7 : vector<128x16xf32>
    %c0_8 = arith.constant 0 : index
    %c0_9 = arith.constant 0 : index
    %9 = vector.load %arg6[%c0_8, %c0_9] : memref<2x34xf32, #tpu.memory_space<vmem>>, vector<2x34xf32>
    %cst_10 = arith.constant dense<0.000000e+00> : vector<128x34xf32>
    %10 = tpu.matmul %1, %9, %cst_10 {dimension_numbers = #tpu.dot_dimension_numbers<[1], [0], [0], [1], [0, 0, 1, 1], [], []>} : vector<128x2xf32>, vector<2x34xf32>, vector<128x34xf32> -> vector<128x34xf32>
    %c0_11 = arith.constant 0 : index
    %c0_12 = arith.constant 0 : index
    %11 = vector.load %arg7[%c0_11, %c0_12] : memref<16x34xf32, #tpu.memory_space<vmem>>, vector<16x34xf32>
    %cst_13 = arith.constant dense<0.000000e+00> : vector<128x34xf32>
    %12 = tpu.matmul %8, %11, %cst_13 {dimension_numbers = #tpu.dot_dimension_numbers<[1], [0], [0], [1], [0, 0, 1, 1], [], []>} : vector<128x16xf32>, vector<16x34xf32>, vector<128x34xf32> -> vector<128x34xf32>
    %c0_14 = arith.constant 0 : index
    %c0_15 = arith.constant 0 : index
    %13 = vector.load %arg8[%c0_14, %c0_15] : memref<1x34xf32, #tpu.memory_space<vmem>>, vector<1x34xf32>
    %14 = vector.broadcast %13 : vector<1x34xf32> to vector<128x34xf32>
    %15 = arith.addf %12, %14 : vector<128x34xf32>
    %16 = arith.mulf %10, %15 : vector<128x34xf32>
    %c0_16 = arith.constant 0 : index
    %c0_17 = arith.constant 0 : index
    %17 = vector.load %arg5[%c0_16, %c0_17] : memref<34x32xf32, #tpu.memory_space<vmem>>, vector<34x32xf32>
    %cst_18 = arith.constant dense<0.000000e+00> : vector<128x32xf32>
    %18 = tpu.matmul %16, %17, %cst_18 {dimension_numbers = #tpu.dot_dimension_numbers<[1], [0], [0], [1], [0, 0, 1, 1], [], []>} : vector<128x34xf32>, vector<34x32xf32>, vector<128x32xf32> -> vector<128x32xf32>
    %19 = arith.truncf %18 : vector<128x32xf32> to vector<128x32xbf16>
    %c0_19 = arith.constant 0 : index
    %c0_20 = arith.constant 0 : index
    %20 = vector.load %arg9[%c0_19, %c0_20] : memref<128x32xbf16, #tpu.memory_space<vmem>>, vector<128x32xbf16>
    tpu.vector_store %arg9[%c0_19, %c0_20], %19 {strides = array<i32>} : memref<128x32xbf16, #tpu.memory_space<vmem>>, vector<128x32xbf16>,
    return
  }
  func.func @transform_0(%arg0: i32) -> (i32, i32) {
    %c0_i32 = arith.constant 0 : i32
    %c0_i32_0 = arith.constant 0 : i32
    return %arg0, %c0_i32 : i32, i32
  }
  func.func @transform_1(%arg0: i32) -> (i32, i32) {
    %c0_i32 = arith.constant 0 : i32
    %c0_i32_0 = arith.constant 0 : i32
    return %arg0, %c0_i32 : i32, i32
  }
  func.func @transform_2(%arg0: i32) -> (i32, i32) {
    %c0_i32 = arith.constant 0 : i32
    %c0_i32_0 = arith.constant 0 : i32
    %c0_i32_1 = arith.constant 0 : i32
    return %c0_i32, %c0_i32_0 : i32, i32
  }
  func.func @transform_3(%arg0: i32) -> (i32, i32) {
    %c0_i32 = arith.constant 0 : i32
    %c0_i32_0 = arith.constant 0 : i32
    %c0_i32_1 = arith.constant 0 : i32
    return %c0_i32, %c0_i32_0 : i32, i32
  }
  func.func @transform_4(%arg0: i32) -> (i32, i32) {
    %c0_i32 = arith.constant 0 : i32
    %c0_i32_0 = arith.constant 0 : i32
    %c0_i32_1 = arith.constant 0 : i32
    return %c0_i32, %c0_i32_0 : i32, i32
  }
  func.func @transform_5(%arg0: i32) -> (i32, i32) {
    %c0_i32 = arith.constant 0 : i32
    %c0_i32_0 = arith.constant 0 : i32
    %c0_i32_1 = arith.constant 0 : i32
    return %c0_i32, %c0_i32_0 : i32, i32
  }
  func.func @transform_6(%arg0: i32) -> (i32, i32) {
    %c0_i32 = arith.constant 0 : i32
    %c0_i32_0 = arith.constant 0 : i32
    %c0_i32_1 = arith.constant 0 : i32
    return %c0_i32, %c0_i32_0 : i32, i32
  }
  func.func @transform_7(%arg0: i32) -> (i32, i32) {
    %c0_i32 = arith.constant 0 : i32
    %c0_i32_0 = arith.constant 0 : i32
    %c0_i32_1 = arith.constant 0 : i32
    return %c0_i32, %c0_i32_0 : i32, i32
  }
  func.func @transform_8(%arg0: i32) -> (i32, i32) {
    %c0_i32 = arith.constant 0 : i32
    %c0_i32_0 = arith.constant 0 : i32
    return %arg0, %c0_i32 : i32, i32
  }
}

</mosaic_0001>

<bundles_post_ra>
// kernel: tpu_custom_call.1
= control target key start
LH: loop header
LB: loop body
LE: loop exit
PB: predicated region body
PF: predicated region fallthrough
CT: control target
= control target key end

     0   :  { %vm118_vm0 = vcmask 1041408   ;;  %vm69_vm1 = vcmask 15360   ;;  %vm489_vm2 = vcmask 130048   ;;  %vm704_vm3 = vcmask 277504   ;;  %s1600_s2 = inlined_call_operand.vmem [shape: f32[2,16], index: 2, kind: input, shape index: {}]   ;;  %s1601_s0 = inlined_call_operand.vmem [shape: f32[128,2], index: 0, kind: input, shape index: {}]   ;;  %s1602_s6 = inlined_call_operand.vmem [shape: f32[16,34], index: 6, kind: input, shape index: {}]   ;;  %s1603_s5 = inlined_call_operand.vmem [shape: f32[2,34], index: 5, kind: input, shape index: {}]   ;;  %s1604_s1 = inlined_call_operand.vmem [shape: f32[128,2], index: 1, kind: input, shape index: {}]   ;;  %s1605_s4 = inlined_call_operand.vmem [shape: f32[34,32], index: 4, kind: input, shape index: {}]   ;;  %s1606_s3 = inlined_call_operand.vmem [shape: f32[1,16], index: 3, kind: input, shape index: {}]   ;;  %s1607_s7 = inlined_call_operand.vmem [shape: f32[1,34], index: 7, kind: input, shape index: {}]   ;;  %s1608_s8 = inlined_call_operand.vmem [shape: bf16[128,32], index: 8, kind: output, shape index: {}]  }
   0x1   :  { %v61_v0 = vld [vmem:[%s1600_s2] sm:$0x3]  ;;  %v30_v2 = vld [vmem:[%s1601_s0 + $0x8] sm:$0xff]  ;;  %v31_v3 = vld [vmem:[%s1601_s0 + $0x10] sm:$0xff]  ;;  %vm965_vm4 = vcmask 257024  }
   0x2   :  { %v29_v1 = vld [vmem:[%s1601_s0] sm:$0xff]  ;;  %1160 = vmatprep.subr.msk.mxu0 %vm118_vm0, %v61_v0  ;;  %v32_v4 = vld [vmem:[%s1601_s0 + $0x18] sm:$0xff]  ;;  %v481_v7 = vld [vmem:[%s1602_s6 + $0x8] sm:$0xff] }
   0x3   :  { %1162 = vmatprep.mubr.msk.f32.mxu0 %vm69_vm1, %v29_v1  ;;  %1161 = vmatpush3.msk.msra.mxu0 %vm118_vm0, %v61_v0  ;;  %v33_v5 = vld [vmem:[%s1601_s0 + $0x20] sm:$0xff]  ;;  %v34_v9 = vld [vmem:[%s1601_s0 + $0x28] sm:$0xff]  ;;  %v35_v10 = vld [vmem:[%s1601_s0 + $0x30] sm:$0xff] }
   0x4   :  { %1163 = vmatmul.mubr.msk.f32.vlgmr.msra.gmra.mrb[0].mxu0 %vm69_vm1, %v30_v2  ;;  %v480_v6 = vld [vmem:[%s1602_s6] sm:$0xff]  ;;  %v36_v11 = vld [vmem:[%s1601_s0 + $0x38] sm:$0xff]  ;;  %v38_v13 = vld [vmem:[%s1601_s0 + $0x48] sm:$0xff] }
   0x5   :  { %1165 = vmatprep.mubr.msk.f32.mxu0 %vm69_vm1, %v31_v3  ;;  %v1274_v8 = vpack.c.bf16 %v481_v7, %v480_v6  ;;  %v37_v12 = vld [vmem:[%s1601_s0 + $0x40] sm:$0xff]  ;;  %v39_v14 = vld [vmem:[%s1601_s0 + $0x50] sm:$0xff]  ;;  %v40_v15 = vld [vmem:[%s1601_s0 + $0x58] sm:$0xff] }
   0x6   :  { %v41_v16 = vld [vmem:[%s1601_s0 + $0x60] sm:$0xff]  ;;  %v42_v17 = vld [vmem:[%s1601_s0 + $0x68] sm:$0xff]  ;;  %v43_v18 = vld [vmem:[%s1601_s0 + $0x70] sm:$0xff] }
   0x7   :  { %1275 = vmatprep.subr.bf16.mxu0 %v1274_v8  ;;  %v44_v19 = vld [vmem:[%s1601_s0 + $0x78] sm:$0xff]  ;;  %v283_v20 = vld [vmem:[%s1603_s5] sm:$0x3]  ;;  %v46_v22 = vld [vmem:[%s1604_s1 + $0x8] sm:$0xff] }
   0x8   :  { %1166 = vmatmul.mubr.msk.f32.gmra.mrb[2].mxu0 %vm69_vm1, %v32_v4  ;;  %1186 = vmatprep.subr.msk.mxu1 %vm118_vm0, %v283_v20  ;;  %v45_v21 = vld [vmem:[%s1604_s1] sm:$0xff]  ;;  %v47_v23 = vld [vmem:[%s1604_s1 + $0x10] sm:$0xff]  ;;  %v48_v24 = vld [vmem:[%s1604_s1 + $0x18] sm:$0xff] }
   0x9   :  { %1168 = vmatprep.mubr.msk.f32.mxu0 %vm69_vm1, %v33_v5  ;;  %1277 = vmatpush3.bf16.msra.mxu0 %v1274_v8  ;;  %v49_v25 = vld [vmem:[%s1604_s1 + $0x20] sm:$0xff]  ;;  %v50_v26 = vld [vmem:[%s1604_s1 + $0x28] sm:$0xff]  ;;  %v51_v27 = vld [vmem:[%s1604_s1 + $0x30] sm:$0xff] }
   0xa   :  { %1187 = vmatpush3.msk.msra.mxu1 %vm118_vm0, %v283_v20  ;;  %1188 = vmatprep.mubr.msk.f32.mxu1 %vm69_vm1, %v45_v21  ;;  %v52_v28 = vld [vmem:[%s1604_s1 + $0x38] sm:$0xff]  ;;  %v53_v29 = vld [vmem:[%s1604_s1 + $0x40] sm:$0xff]  ;;  %v54_v30 = vld [vmem:[%s1604_s1 + $0x48] sm:$0xff] }
   0xb   :  { %1189 = vmatmul.mubr.msk.f32.vlgmr.msra.gmra.mrb[0].mxu1 %vm69_vm1, %v46_v22  ;;  %v55_v31 = vld [vmem:[%s1604_s1 + $0x50] sm:$0xff]  ;;  %v56_v32 = vld [vmem:[%s1604_s1 + $0x58] sm:$0xff]  ;;  %v57_v33 = vld [vmem:[%s1604_s1 + $0x60] sm:$0xff] }
   0xc   :  { %1169 = vmatmul.mubr.msk.f32.gmra.mrb[4].mxu0 %vm69_vm1, %v34_v9  ;;  %1191 = vmatprep.mubr.msk.f32.mxu1 %vm69_vm1, %v47_v23  ;;  %v58_v34 = vld [vmem:[%s1604_s1 + $0x68] sm:$0xff]  ;;  %v59_v35 = vld [vmem:[%s1604_s1 + $0x70] sm:$0xff]  ;;  %v60_v36 = vld [vmem:[%s1604_s1 + $0x78] sm:$0xff] }
   0xd   :  { %1171 = vmatprep.mubr.msk.f32.mxu0 %vm69_vm1, %v35_v10  ;;  %v699_v37 = vld [vmem:[%s1605_s4] sm:$0xff]  ;;  %v700_v38 = vld [vmem:[%s1605_s4 + $0x8] sm:$0xff]  ;;  %v701_v39 = vld [vmem:[%s1605_s4 + $0x10] sm:$0xff] }
   0xe   :  { %v1278_v40 = vpack.c.bf16 %v700_v38, %v699_v37  ;;  %v702_v41 = vld [vmem:[%s1605_s4 + $0x18] sm:$0xff]  ;;  %v703_v43 = vld [vmem:[%s1605_s4 + $0x20] sm:$0x3] }
   0xf   :  { %1192 = vmatmul.mubr.msk.f32.gmra.mrb[2].mxu1 %vm69_vm1, %v48_v24  ;;  %v1282_v42 = vpack.c.bf16 %v702_v41, %v701_v39  ;;  %v986_v44 = vld [vmem:[%s1606_s3] ss:$0 sm:$0xff] }
  0x10   :  { %1172 = vmatmul.mubr.msk.f32.gmra.mrb[6].mxu0 %vm69_vm1, %v36_v11  ;;  %1194 = vmatprep.mubr.msk.f32.mxu1 %vm69_vm1, %v49_v25 }
  0x11   :  { %1174 = vmatprep.mubr.msk.f32.mxu0 %vm69_vm1, %v37_v12  ;;  %1279 = vmatprep.subr.bf16.mxu1 %v1278_v40 }
  0x12   :  { %1281 = vmatpush3.bf16.msra.mxu1 %v1278_v40 }
  0x13   :  { %1195 = vmatmul.mubr.msk.f32.gmra.mrb[4].mxu1 %vm69_vm1, %v50_v26  ;;  %1283 = vmatprep.subr.bf16.mxu1 %v1282_v42 }
  0x14   :  { %1175 = vmatmul.mubr.msk.f32.gmra.mrb[8].mxu0 %vm69_vm1, %v38_v13  ;;  %1197 = vmatprep.mubr.msk.f32.mxu1 %vm69_vm1, %v51_v27 }
  0x15   :  { %1177 = vmatprep.mubr.msk.f32.mxu0 %vm69_vm1, %v39_v14 }
  0x16   :  { %1285 = vmatpush3.bf16.msra.mxu1 %v1282_v42 }
  0x17   :  { %1198 = vmatmul.mubr.msk.f32.gmra.mrb[6].mxu1 %vm69_vm1, %v52_v28  ;;  %1248 = vmatprep.subr.msk.mxu1 %vm118_vm0, %v703_v43 }
  0x18   :  { %1178 = vmatmul.mubr.msk.f32.gmra.mrb[10].mxu0 %vm69_vm1, %v40_v15  ;;  %1200 = vmatprep.mubr.msk.f32.mxu1 %vm69_vm1, %v53_v29 }
  0x19   :  { %1180 = vmatprep.mubr.msk.f32.mxu0 %vm69_vm1, %v41_v16 }
  0x1a   :  { %1249 = vmatpush3.msk.msra.mxu1 %vm118_vm0, %v703_v43 }
  0x1b   :  { %1201 = vmatmul.mubr.msk.f32.gmra.mrb[8].mxu1 %vm69_vm1, %v54_v30 }
  0x1c   :  { %1181 = vmatmul.mubr.msk.f32.gmra.mrb[12].mxu0 %vm69_vm1, %v42_v17  ;;  %1203 = vmatprep.mubr.msk.f32.mxu1 %vm69_vm1, %v55_v31 }
  0x1d   :  { %1183 = vmatprep.mubr.msk.f32.mxu0 %vm69_vm1, %v43_v18 }
  0x1f   :  { %1204 = vmatmul.mubr.msk.f32.gmra.mrb[10].mxu1 %vm69_vm1, %v56_v32 }
  0x20   :  { %1184 = vmatmul.mubr.msk.f32.gmra.mrb[14].mxu0 %vm69_vm1, %v44_v19  ;;  %1206 = vmatprep.mubr.msk.f32.mxu1 %vm69_vm1, %v57_v33 }
  0x23   :  { %1207 = vmatmul.mubr.msk.f32.gmra.mrb[12].mxu1 %vm69_vm1, %v58_v34 }
  0x24   :  { %1209 = vmatprep.mubr.msk.f32.mxu1 %vm69_vm1, %v59_v35 }
  0x27   :  { %1210 = vmatmul.mubr.msk.f32.gmra.mrb[14].mxu1 %vm69_vm1, %v60_v36 }
  0xd7   :  { %v1164_v45 = vpop.f32.mrb[0].mxu0 }
  0xd8   :  { %v194_v46 = vadd.f32 %v1164_v45, %v986_v44  ;;  %v188_v47 = vpop.f32.mrb[1].mxu0  ;;  %v1021_v45 = vld [vmem:[%s1607_s7] ss:$0 sm:$0xff] }
  0xd9   :  { %v189_v48 = vadd.f32 %v986_v44, %v188_v47 }
  0xda   :  { %v268_v51 = vmax.f32 %v194_v46, 0.0 }
  0xdb   :  { %v267_v49 = vmax.f32 %v189_v48, 0.0  ;;  %v1167_v50 = vpop.f32.mrb[2].mxu0 }
  0xdc   :  { %v204_v52 = vadd.f32 %v1167_v50, %v986_v44  ;;  %v198_v53 = vpop.f32.mrb[3].mxu0 }
  0xdd   :  { %v199_v54 = vadd.f32 %v986_v44, %v198_v53  ;;  %1216 = vmatprep.mubr.msk.f32.mxu0 %vm489_vm2, %v267_v49 }
  0xde   :  { %1217 = vmatmul.mubr.msk.f32.vlgmr.msra.gmra.mrb[16].mxu0 %vm489_vm2, %v268_v51  ;;  %v270_v57 = vmax.f32 %v204_v52, 0.0  ;;  %v1190_v29 = vpop.f32.mrb[0].mxu1 }
  0xdf   :  { %v269_v55 = vmax.f32 %v199_v54, 0.0  ;;  %v1170_v56 = vpop.f32.mrb[4].mxu0  ;;  %v401_v30 = vpop.f32.mrb[1].mxu1 }
  0xe0   :  { %v214_v58 = vadd.f32 %v1170_v56, %v986_v44  ;;  %v208_v59 = vpop.f32.mrb[5].mxu0 }
  0xe1   :  { %v209_v60 = vadd.f32 %v986_v44, %v208_v59  ;;  %1219 = vmatprep.mubr.msk.f32.mxu0 %vm489_vm2, %v269_v55 }
  0xe2   :  { %1220 = vmatmul.mubr.msk.f32.gmra.mrb[18].mxu0 %vm489_vm2, %v270_v57  ;;  %v272_v63 = vmax.f32 %v214_v58, 0.0  ;;  %v1193_v31 = vpop.f32.mrb[2].mxu1 }
  0xe3   :  { %v271_v61 = vmax.f32 %v209_v60, 0.0  ;;  %v1173_v62 = vpop.f32.mrb[6].mxu0  ;;  %v411_v32 = vpop.f32.mrb[3].mxu1 }
  0xe4   :  { %v224_v0 = vadd.f32 %v1173_v62, %v986_v44  ;;  %v218_v1 = vpop.f32.mrb[7].mxu0 }
  0xe5   :  { %v219_v2 = vadd.f32 %v986_v44, %v218_v1  ;;  %1222 = vmatprep.mubr.msk.f32.mxu0 %vm489_vm2, %v271_v61 }
  0xe6   :  { %1223 = vmatmul.mubr.msk.f32.gmra.mrb[20].mxu0 %vm489_vm2, %v272_v63  ;;  %v274_v5 = vmax.f32 %v224_v0, 0.0  ;;  %v1196_v33 = vpop.f32.mrb[4].mxu1 }
  0xe7   :  { %v273_v3 = vmax.f32 %v219_v2, 0.0  ;;  %v1176_v4 = vpop.f32.mrb[8].mxu0  ;;  %v421_v34 = vpop.f32.mrb[5].mxu1 }
  0xe8   :  { %v234_v6 = vadd.f32 %v1176_v4, %v986_v44  ;;  %v228_v7 = vpop.f32.mrb[9].mxu0 }
  0xe9   :  { %v229_v8 = vadd.f32 %v986_v44, %v228_v7  ;;  %1225 = vmatprep.mubr.msk.f32.mxu0 %vm489_vm2, %v273_v3 }
  0xea   :  { %1226 = vmatmul.mubr.msk.f32.gmra.mrb[22].mxu0 %vm489_vm2, %v274_v5  ;;  %v276_v11 = vmax.f32 %v234_v6, 0.0  ;;  %v1199_v35 = vpop.f32.mrb[6].mxu1 }
  0xeb   :  { %v275_v9 = vmax.f32 %v229_v8, 0.0  ;;  %v1179_v10 = vpop.f32.mrb[10].mxu0  ;;  %v431_v36 = vpop.f32.mrb[7].mxu1 }
  0xec   :  { %v244_v12 = vadd.f32 %v1179_v10, %v986_v44  ;;  %v238_v13 = vpop.f32.mrb[11].mxu0 }
  0xed   :  { %v239_v14 = vadd.f32 %v986_v44, %v238_v13  ;;  %1228 = vmatprep.mubr.msk.f32.mxu0 %vm489_vm2, %v275_v9 }
  0xee   :  { %1229 = vmatmul.mubr.msk.f32.gmra.mrb[24].mxu0 %vm489_vm2, %v276_v11  ;;  %v278_v17 = vmax.f32 %v244_v12, 0.0  ;;  %v1202_v37 = vpop.f32.mrb[8].mxu1 }
  0xef   :  { %v277_v15 = vmax.f32 %v239_v14, 0.0  ;;  %v1182_v16 = vpop.f32.mrb[12].mxu0  ;;  %v441_v38 = vpop.f32.mrb[9].mxu1 }
  0xf0   :  { %v254_v18 = vadd.f32 %v1182_v16, %v986_v44  ;;  %v248_v19 = vpop.f32.mrb[13].mxu0 }
  0xf1   :  { %v249_v20 = vadd.f32 %v986_v44, %v248_v19  ;;  %1231 = vmatprep.mubr.msk.f32.mxu0 %vm489_vm2, %v277_v15 }
  0xf2   :  { %1232 = vmatmul.mubr.msk.f32.gmra.mrb[26].mxu0 %vm489_vm2, %v278_v17  ;;  %v280_v23 = vmax.f32 %v254_v18, 0.0  ;;  %v1205_v39 = vpop.f32.mrb[10].mxu1 }
  0xf3   :  { %v279_v21 = vmax.f32 %v249_v20, 0.0  ;;  %v1185_v22 = vpop.f32.mrb[14].mxu0  ;;  %v451_v40 = vpop.f32.mrb[11].mxu1 }
  0xf4   :  { %v264_v24 = vadd.f32 %v1185_v22, %v986_v44  ;;  %v258_v25 = vpop.f32.mrb[15].mxu0 }
  0xf5   :  { %v259_v26 = vadd.f32 %v986_v44, %v258_v25  ;;  %1234 = vmatprep.mubr.msk.f32.mxu0 %vm489_vm2, %v279_v21 }
  0xf6   :  { %1235 = vmatmul.mubr.msk.f32.gmra.mrb[28].mxu0 %vm489_vm2, %v280_v23  ;;  %v282_v28 = vmax.f32 %v264_v24, 0.0  ;;  %v1208_v41 = vpop.f32.mrb[12].mxu1 }
  0xf7   :  { %v281_v27 = vmax.f32 %v259_v26, 0.0  ;;  %v461_v42 = vpop.f32.mrb[13].mxu1 }
  0xf9   :  { %1237 = vmatprep.mubr.msk.f32.mxu0 %vm489_vm2, %v281_v27 }
  0xfa   :  { %1238 = vmatmul.mubr.msk.f32.gmra.mrb[30].mxu0 %vm489_vm2, %v282_v28  ;;  %v1511_v43 = vpop.f32.mrb[14].mxu1 }
  0xfb   :  { %v1513_v44 = vpop.f32.mrb[15].mxu1 }
 0x1b1   :  { %v1218_v46 = vpop.f32.mrb[16].mxu0 }
 0x1b2   :  { %v610_v47 = vadd.f32 %v1218_v46, %v1021_v45  ;;  %v604_v48 = vpop.f32.mrb[17].mxu0 }
 0x1b3   :  { %v605_v49 = vadd.f32 %v1021_v45, %v604_v48 }
 0x1b4   :  { %v684_v50 = vmul.f32 %v1190_v29, %v610_v47 }
 0x1b5   :  { %v683_v51 = vmul.f32 %v605_v49, %v401_v30  ;;  %v1221_v52 = vpop.f32.mrb[18].mxu0 }
 0x1b6   :  { %v620_v53 = vadd.f32 %v1221_v52, %v1021_v45  ;;  %v614_v54 = vpop.f32.mrb[19].mxu0 }
 0x1b7   :  { %v615_v55 = vadd.f32 %v1021_v45, %v614_v54  ;;  %1250 = vmatprep.mubr.msk.f32.mxu1 %vm704_vm3, %v683_v51 }
 0x1b8   :  { %v686_v56 = vmul.f32 %v1193_v31, %v620_v53  ;;  %1251 = vmatmul.mubr.msk.f32.vlgmr.msra.gmra.mrb[16].mxu1 %vm704_vm3, %v684_v50 }
 0x1b9   :  { %v685_v57 = vmul.f32 %v615_v55, %v411_v32  ;;  %v1224_v58 = vpop.f32.mrb[20].mxu0 }
 0x1ba   :  { %v630_v59 = vadd.f32 %v1224_v58, %v1021_v45  ;;  %v624_v60 = vpop.f32.mrb[21].mxu0 }
 0x1bb   :  { %v625_v61 = vadd.f32 %v1021_v45, %v624_v60  ;;  %1253 = vmatprep.mubr.msk.f32.mxu1 %vm704_vm3, %v685_v57 }
 0x1bc   :  { %v688_v62 = vmul.f32 %v1196_v33, %v630_v59  ;;  %1254 = vmatmul.mubr.msk.f32.gmra.mrb[18].mxu1 %vm704_vm3, %v686_v56 }
 0x1bd   :  { %v687_v63 = vmul.f32 %v625_v61, %v421_v34  ;;  %v1227_v0 = vpop.f32.mrb[22].mxu0 }
 0x1be   :  { %v640_v1 = vadd.f32 %v1227_v0, %v1021_v45  ;;  %v634_v2 = vpop.f32.mrb[23].mxu0 }
 0x1bf   :  { %v635_v3 = vadd.f32 %v1021_v45, %v634_v2  ;;  %1256 = vmatprep.mubr.msk.f32.mxu1 %vm704_vm3, %v687_v63 }
 0x1c0   :  { %v690_v4 = vmul.f32 %v1199_v35, %v640_v1  ;;  %1257 = vmatmul.mubr.msk.f32.gmra.mrb[20].mxu1 %vm704_vm3, %v688_v62 }
 0x1c1   :  { %v689_v5 = vmul.f32 %v635_v3, %v431_v36  ;;  %v1230_v6 = vpop.f32.mrb[24].mxu0 }
 0x1c2   :  { %v650_v7 = vadd.f32 %v1230_v6, %v1021_v45  ;;  %v644_v8 = vpop.f32.mrb[25].mxu0 }
 0x1c3   :  { %v645_v9 = vadd.f32 %v1021_v45, %v644_v8  ;;  %1259 = vmatprep.mubr.msk.f32.mxu1 %vm704_vm3, %v689_v5 }
 0x1c4   :  { %v692_v10 = vmul.f32 %v1202_v37, %v650_v7  ;;  %1260 = vmatmul.mubr.msk.f32.gmra.mrb[22].mxu1 %vm704_vm3, %v690_v4 }
 0x1c5   :  { %v691_v11 = vmul.f32 %v645_v9, %v441_v38  ;;  %v1233_v12 = vpop.f32.mrb[26].mxu0 }
 0x1c6   :  { %v660_v13 = vadd.f32 %v1233_v12, %v1021_v45  ;;  %v654_v14 = vpop.f32.mrb[27].mxu0 }
 0x1c7   :  { %v655_v15 = vadd.f32 %v1021_v45, %v654_v14  ;;  %1262 = vmatprep.mubr.msk.f32.mxu1 %vm704_vm3, %v691_v11 }
 0x1c8   :  { %v694_v16 = vmul.f32 %v1205_v39, %v660_v13  ;;  %1263 = vmatmul.mubr.msk.f32.gmra.mrb[24].mxu1 %vm704_vm3, %v692_v10 }
 0x1c9   :  { %v693_v17 = vmul.f32 %v655_v15, %v451_v40  ;;  %v1236_v18 = vpop.f32.mrb[28].mxu0 }
 0x1ca   :  { %v670_v19 = vadd.f32 %v1236_v18, %v1021_v45  ;;  %v664_v20 = vpop.f32.mrb[29].mxu0 }
 0x1cb   :  { %v665_v21 = vadd.f32 %v1021_v45, %v664_v20  ;;  %1265 = vmatprep.mubr.msk.f32.mxu1 %vm704_vm3, %v693_v17 }
 0x1cc   :  { %v696_v22 = vmul.f32 %v1208_v41, %v670_v19  ;;  %1266 = vmatmul.mubr.msk.f32.gmra.mrb[26].mxu1 %vm704_vm3, %v694_v16 }
 0x1cd   :  { %v695_v23 = vmul.f32 %v665_v21, %v461_v42  ;;  %v1239_v24 = vpop.f32.mrb[30].mxu0 }
 0x1ce   :  { %v680_v25 = vadd.f32 %v1239_v24, %v1021_v45  ;;  %v674_v26 = vpop.f32.mrb[31].mxu0 }
 0x1cf   :  { %v675_v27 = vadd.f32 %v1021_v45, %v674_v26  ;;  %1268 = vmatprep.mubr.msk.f32.mxu1 %vm704_vm3, %v695_v23 }
 0x1d0   :  { %v698_v28 = vmul.f32 %v1511_v43, %v680_v25  ;;  %1269 = vmatmul.mubr.msk.f32.gmra.mrb[28].mxu1 %vm704_vm3, %v696_v22 }
 0x1d1   :  { %v697_v29 = vmul.f32 %v675_v27, %v1513_v44 }
 0x1d3   :  { %1271 = vmatprep.mubr.msk.f32.mxu1 %vm704_vm3, %v697_v29 }
 0x1d4   :  { %1272 = vmatmul.mubr.msk.f32.gmra.mrb[30].mxu1 %vm704_vm3, %v698_v28 }
 0x28b   :  { %v1252_v30 = vpop.f32.mrb[16].mxu1 }
 0x28c   :  { %v1072_v31 = vpack.c.bf16 %v1252_v30, %v1252_v30  ;;  %v822_v32 = vpop.f32.mrb[17].mxu1 }
 0x28d   :  { %v1071_v33 = vpack.c.bf16 %v822_v32, %v822_v32 }
 0x28e   :  { %967 = vst.msk [vmem:[%s1608_s8 + $0x4] sm:$0xf] %vm965_vm4, %v1072_v31 }
 0x28f   :  { %966 = vst.msk [vmem:[%s1608_s8] sm:$0xf] %vm965_vm4, %v1071_v33  ;;  %v1255_v34 = vpop.f32.mrb[18].mxu1 }
 0x290   :  { %v1074_v35 = vpack.c.bf16 %v1255_v34, %v1255_v34  ;;  %v832_v36 = vpop.f32.mrb[19].mxu1 }
 0x291   :  { %v1073_v37 = vpack.c.bf16 %v832_v36, %v832_v36 }
 0x292   :  { %969 = vst.msk [vmem:[%s1608_s8 + $0xc] sm:$0xf] %vm965_vm4, %v1074_v35 }
 0x293   :  { %968 = vst.msk [vmem:[%s1608_s8 + $0x8] sm:$0xf] %vm965_vm4, %v1073_v37  ;;  %v1258_v38 = vpop.f32.mrb[20].mxu1 }
 0x294   :  { %v1076_v39 = vpack.c.bf16 %v1258_v38, %v1258_v38  ;;  %v842_v40 = vpop.f32.mrb[21].mxu1 }
 0x295   :  { %v1075_v41 = vpack.c.bf16 %v842_v40, %v842_v40 }
 0x296   :  { %971 = vst.msk [vmem:[%s1608_s8 + $0x14] sm:$0xf] %vm965_vm4, %v1076_v39 }
 0x297   :  { %970 = vst.msk [vmem:[%s1608_s8 + $0x10] sm:$0xf] %vm965_vm4, %v1075_v41  ;;  %v1261_v42 = vpop.f32.mrb[22].mxu1 }
 0x298   :  { %v1078_v43 = vpack.c.bf16 %v1261_v42, %v1261_v42  ;;  %v852_v44 = vpop.f32.mrb[23].mxu1 }
 0x299   :  { %v1077_v45 = vpack.c.bf16 %v852_v44, %v852_v44 }
 0x29a   :  { %973 = vst.msk [vmem:[%s1608_s8 + $0x1c] sm:$0xf] %vm965_vm4, %v1078_v43 }
 0x29b   :  { %972 = vst.msk [vmem:[%s1608_s8 + $0x18] sm:$0xf] %vm965_vm4, %v1077_v45  ;;  %v1264_v46 = vpop.f32.mrb[24].mxu1 }
 0x29c   :  { %v1080_v47 = vpack.c.bf16 %v1264_v46, %v1264_v46  ;;  %v862_v48 = vpop.f32.mrb[25].mxu1 }
 0x29d   :  { %v1079_v49 = vpack.c.bf16 %v862_v48, %v862_v48 }
 0x29e   :  { %975 = vst.msk [vmem:[%s1608_s8 + $0x24] sm:$0xf] %vm965_vm4, %v1080_v47 }
 0x29f   :  { %974 = vst.msk [vmem:[%s1608_s8 + $0x20] sm:$0xf] %vm965_vm4, %v1079_v49  ;;  %v1267_v50 = vpop.f32.mrb[26].mxu1 }
 0x2a0   :  { %v1082_v51 = vpack.c.bf16 %v1267_v50, %v1267_v50  ;;  %v872_v52 = vpop.f32.mrb[27].mxu1 }
 0x2a1   :  { %v1081_v53 = vpack.c.bf16 %v872_v52, %v872_v52 }
 0x2a2   :  { %977 = vst.msk [vmem:[%s1608_s8 + $0x2c] sm:$0xf] %vm965_vm4, %v1082_v51 }
 0x2a3   :  { %976 = vst.msk [vmem:[%s1608_s8 + $0x28] sm:$0xf] %vm965_vm4, %v1081_v53  ;;  %v1270_v54 = vpop.f32.mrb[28].mxu1 }
 0x2a4   :  { %v1084_v55 = vpack.c.bf16 %v1270_v54, %v1270_v54  ;;  %v882_v56 = vpop.f32.mrb[29].mxu1 }
 0x2a5   :  { %v1083_v57 = vpack.c.bf16 %v882_v56, %v882_v56 }
 0x2a6   :  { %979 = vst.msk [vmem:[%s1608_s8 + $0x34] sm:$0xf] %vm965_vm4, %v1084_v55 }
 0x2a7   :  { %978 = vst.msk [vmem:[%s1608_s8 + $0x30] sm:$0xf] %vm965_vm4, %v1083_v57  ;;  %v1273_v58 = vpop.f32.mrb[30].mxu1 }
 0x2a8   :  { %v1086_v59 = vpack.c.bf16 %v1273_v58, %v1273_v58  ;;  %v892_v60 = vpop.f32.mrb[31].mxu1 }
 0x2a9   :  { %v1085_v61 = vpack.c.bf16 %v892_v60, %v892_v60 }
 0x2aa   :  { %981 = vst.msk [vmem:[%s1608_s8 + $0x3c] sm:$0xf] %vm965_vm4, %v1086_v59 }
 0x2ab   :  { %980 = vst.msk [vmem:[%s1608_s8 + $0x38] sm:$0xf] %vm965_vm4, %v1085_v61 }

</bundles_post_ra>
